<compile_context>
chip_gen: v5e
topology: v5e:2x2
jax: 0.10.0
libtpu: 0.0.40
codegen_flags: <defaults>
</compile_context>

<pallas_src>
import jax
import jax.numpy as jnp
from jax.experimental import pallas as pl
from jax.experimental.pallas import tpu as pltpu


def _dqn_kernel(x_ref, w1_ref, b1_ref, w2_ref, b2_ref, w3_ref, b3_ref, o_ref):
    # fc1 + ReLU  (bf16 x bf16 -> f32 accumulate on the MXU)
    h = jnp.dot(x_ref[...], w1_ref[...], preferred_element_type=jnp.float32)
    h = jnp.maximum(h + b1_ref[...], 0.0)
    # fc2 + ReLU
    h = jnp.dot(h.astype(jnp.bfloat16), w2_ref[...],
                preferred_element_type=jnp.float32)
    h = jnp.maximum(h + b2_ref[...], 0.0)
    # out (no activation); b3 is zero-padded on the lane-padded tail.
    h = jnp.dot(h.astype(jnp.bfloat16), w3_ref[...],
                preferred_element_type=jnp.float32)
    o_ref[...] = (h + b3_ref[...]).astype(o_ref.dtype)


def deep_q_forward(x, w1, b1, w2, b2, w3, b3, *, block_b=512):
    """Fused 3-layer MLP forward.  Returns f32 [B, out_actions]."""
    B, in_states = x.shape
    h1 = w1.shape[1]
    out_actions = w3.shape[1]

    # --- Lane-dense output: pad action dim up to a multiple of 128 lanes. ---
    n_pad = max(128, pl.cdiv(out_actions, 128) * 128)
    w3p = jnp.zeros((h1, n_pad), w3.dtype).at[:, :out_actions].set(w3)
    b3p = jnp.zeros((1, n_pad), b3.dtype).at[:, :out_actions].set(b3)

    # --- Batch tile: multiple of 8 sublanes, capped at block_b rows. --------
    tb = min(block_b, pl.cdiv(B, 8) * 8)
    b_pad = pl.cdiv(B, tb) * tb
    if b_pad != B:
        x = jnp.pad(x, ((0, b_pad - B), (0, 0)))

    # --- bf16 on the MXU path; biases stay f32 for f32 bias/ReLU math. ------
    xb = x.astype(jnp.bfloat16)
    w1b = w1.astype(jnp.bfloat16)
    w2b = w2.astype(jnp.bfloat16)
    w3b = w3p.astype(jnp.bfloat16)

    # Resident (non-tiled) operands: same block every grid step -> one DMA,
    # stays in VMEM across all batch tiles.
    def resident(a):
        nd = a.ndim
        return pl.BlockSpec(a.shape, lambda i, _nd=nd: (0,) * _nd)

    out = pl.pallas_call(
        _dqn_kernel,
        out_shape=jax.ShapeDtypeStruct((b_pad, n_pad), jnp.float32),
        grid=(b_pad // tb,),
        in_specs=[
            pl.BlockSpec((tb, in_states), lambda i: (i, 0)),   # x: tiled on B
            resident(w1b), resident(b1),
            resident(w2b), resident(b2),
            resident(w3b), resident(b3p),
        ],
        out_specs=pl.BlockSpec((tb, n_pad), lambda i: (i, 0)),
        compiler_params=pltpu.CompilerParams(
            dimension_semantics=("parallel",)),  # v7x: use both TensorCores
    )(xb, w1b, b1, w2b, b2, w3b, b3p)

    return out[:B, :out_actions]


def init_params(key, in_states, h1_nodes, out_actions):
    # Deterministic init mimicking nn.Linear's U(-1/sqrt(fan_in), 1/sqrt(fan_in)).
    ks = jax.random.split(key, 6)

    def linear(kw, kb, fan_in, fan_out):
        bound = 1.0 / jnp.sqrt(fan_in)
        w = jax.random.uniform(kw, (fan_in, fan_out), jnp.float32, -bound, bound)
        b = jax.random.uniform(kb, (1, fan_out), jnp.float32, -bound, bound)
        return w, b

    w1, b1 = linear(ks[0], ks[1], in_states, h1_nodes)
    w2, b2 = linear(ks[2], ks[3], h1_nodes, h1_nodes)
    w3, b3 = linear(ks[4], ks[5], h1_nodes, out_actions)
    return w1, b1, w2, b2, w3, b3


def _ref_forward(x, w1, b1, w2, b2, w3, b3):
    # Pure-JAX reference mimicking the kernel's bf16-MXU / f32-accumulate path.
    bf = jnp.bfloat16
    h = jnp.dot(x.astype(bf), w1.astype(bf), preferred_element_type=jnp.float32)
    h = jnp.maximum(h + b1, 0.0)
    h = jnp.dot(h.astype(bf), w2.astype(bf), preferred_element_type=jnp.float32)
    h = jnp.maximum(h + b2, 0.0)
    h = jnp.dot(h.astype(bf), w3.astype(bf), preferred_element_type=jnp.float32)
    return h + b3


if __name__ == "__main__":
    key = jax.random.PRNGKey(0)
    in_states, h1_nodes, out_actions = 16, 32, 4
    batch = 8

    k_x, k_p = jax.random.split(key)
    x = jax.random.normal(k_x, (batch, in_states), jnp.float32)
    params = init_params(k_p, in_states, h1_nodes, out_actions)

    out = deep_q_forward(x, *params)
    jax.block_until_ready(out)

    ref = _ref_forward(x, *params)
    assert out.shape == (batch, out_actions)
    assert jnp.allclose(out, ref, atol=1e-2, rtol=1e-2), (
        f"max abs err {jnp.max(jnp.abs(out - ref))}")

    # TODO(synk): fusing the full DQN update (online + target nets, gather,
    # max, loss) into one kernel is the next overhead win but changes the
    # module's forward-only semantics, so it is left out here.

    print("KERNEL_OK")
</pallas_src>

<mosaic_0001>
module attributes {stable_mosaic.version = 11 : i64} {
  func.func @_dqn_kernel(%arg0: i32, %arg1: memref<8x16xbf16, #tpu.memory_space<vmem>>, %arg2: memref<16x32xbf16, #tpu.memory_space<vmem>>, %arg3: memref<1x32xf32, #tpu.memory_space<vmem>>, %arg4: memref<32x32xbf16, #tpu.memory_space<vmem>>, %arg5: memref<1x32xf32, #tpu.memory_space<vmem>>, %arg6: memref<32x128xbf16, #tpu.memory_space<vmem>>, %arg7: memref<1x128xf32, #tpu.memory_space<vmem>>, %arg8: memref<8x128xf32, #tpu.memory_space<vmem>>) attributes {dimension_semantics = [#tpu.dimension_semantics<parallel>], iteration_bounds = array<i64: 1>, scalar_prefetch = 0 : i64, scratch_operands = 0 : i64, tpu.core_type = #tpu.core_type<tc>, window_params = [{transform_indices = @transform_0, window_bounds = array<i64: 8, 16>}, {pipeline_mode = #tpu.pipeline_mode<synchronous>, transform_indices = @transform_1, window_bounds = array<i64: 16, 32>}, {pipeline_mode = #tpu.pipeline_mode<synchronous>, transform_indices = @transform_2, window_bounds = array<i64: 1, 32>}, {pipeline_mode = #tpu.pipeline_mode<synchronous>, transform_indices = @transform_3, window_bounds = array<i64: 32, 32>}, {pipeline_mode = #tpu.pipeline_mode<synchronous>, transform_indices = @transform_4, window_bounds = array<i64: 1, 32>}, {pipeline_mode = #tpu.pipeline_mode<synchronous>, transform_indices = @transform_5, window_bounds = array<i64: 32, 128>}, {pipeline_mode = #tpu.pipeline_mode<synchronous>, transform_indices = @transform_6, window_bounds = array<i64: 1, 128>}, {transform_indices = @transform_7, window_bounds = array<i64: 8, 128>}]} {
    %c0 = arith.constant 0 : index
    %c0_0 = arith.constant 0 : index
    %0 = vector.load %arg1[%c0, %c0_0] : memref<8x16xbf16, #tpu.memory_space<vmem>>, vector<8x16xbf16>
    %c0_1 = arith.constant 0 : index
    %c0_2 = arith.constant 0 : index
    %1 = vector.load %arg2[%c0_1, %c0_2] : memref<16x32xbf16, #tpu.memory_space<vmem>>, vector<16x32xbf16>
    %cst = arith.constant dense<0.000000e+00> : vector<8x32xf32>
    %2 = tpu.matmul %0, %1, %cst {dimension_numbers = #tpu.dot_dimension_numbers<[1], [0], [0], [1], [0, 0, 1, 1], [], []>} : vector<8x16xbf16>, vector<16x32xbf16>, vector<8x32xf32> -> vector<8x32xf32>
    %c0_3 = arith.constant 0 : index
    %c0_4 = arith.constant 0 : index
    %3 = vector.load %arg3[%c0_3, %c0_4] : memref<1x32xf32, #tpu.memory_space<vmem>>, vector<1x32xf32>
    %4 = vector.broadcast %3 : vector<1x32xf32> to vector<8x32xf32>
    %5 = arith.addf %2, %4 : vector<8x32xf32>
    %cst_5 = arith.constant 0.000000e+00 : f32
    %6 = vector.broadcast %cst_5 : f32 to vector<8x32xf32>
    %7 = arith.maximumf %5, %6 : vector<8x32xf32>
    %8 = arith.truncf %7 : vector<8x32xf32> to vector<8x32xbf16>
    %c0_6 = arith.constant 0 : index
    %c0_7 = arith.constant 0 : index
    %9 = vector.load %arg4[%c0_6, %c0_7] : memref<32x32xbf16, #tpu.memory_space<vmem>>, vector<32x32xbf16>
    %cst_8 = arith.constant dense<0.000000e+00> : vector<8x32xf32>
    %10 = tpu.matmul %8, %9, %cst_8 {dimension_numbers = #tpu.dot_dimension_numbers<[1], [0], [0], [1], [0, 0, 1, 1], [], []>} : vector<8x32xbf16>, vector<32x32xbf16>, vector<8x32xf32> -> vector<8x32xf32>
    %c0_9 = arith.constant 0 : index
    %c0_10 = arith.constant 0 : index
    %11 = vector.load %arg5[%c0_9, %c0_10] : memref<1x32xf32, #tpu.memory_space<vmem>>, vector<1x32xf32>
    %12 = vector.broadcast %11 : vector<1x32xf32> to vector<8x32xf32>
    %13 = arith.addf %10, %12 : vector<8x32xf32>
    %cst_11 = arith.constant 0.000000e+00 : f32
    %14 = vector.broadcast %cst_11 : f32 to vector<8x32xf32>
    %15 = arith.maximumf %13, %14 : vector<8x32xf32>
    %16 = arith.truncf %15 : vector<8x32xf32> to vector<8x32xbf16>
    %c0_12 = arith.constant 0 : index
    %c0_13 = arith.constant 0 : index
    %17 = vector.load %arg6[%c0_12, %c0_13] : memref<32x128xbf16, #tpu.memory_space<vmem>>, vector<32x128xbf16>
    %cst_14 = arith.constant dense<0.000000e+00> : vector<8x128xf32>
    %18 = tpu.matmul %16, %17, %cst_14 {dimension_numbers = #tpu.dot_dimension_numbers<[1], [0], [0], [1], [0, 0, 1, 1], [], []>} : vector<8x32xbf16>, vector<32x128xbf16>, vector<8x128xf32> -> vector<8x128xf32>
    %c0_15 = arith.constant 0 : index
    %c0_16 = arith.constant 0 : index
    %19 = vector.load %arg7[%c0_15, %c0_16] : memref<1x128xf32, #tpu.memory_space<vmem>>, vector<1x128xf32>
    %20 = vector.broadcast %19 : vector<1x128xf32> to vector<8x128xf32>
    %21 = arith.addf %18, %20 : vector<8x128xf32>
    %c0_17 = arith.constant 0 : index
    %c0_18 = arith.constant 0 : index
    %22 = vector.load %arg8[%c0_17, %c0_18] : memref<8x128xf32, #tpu.memory_space<vmem>>, vector<8x128xf32>
    tpu.vector_store %arg8[%c0_17, %c0_18], %21 {strides = array<i32>} : memref<8x128xf32, #tpu.memory_space<vmem>>, vector<8x128xf32>,
    return
  }
  func.func @transform_0(%arg0: i32) -> (i32, i32) {
    %c0_i32 = arith.constant 0 : i32
    %c0_i32_0 = arith.constant 0 : i32
    return %arg0, %c0_i32 : i32, i32
  }
  func.func @transform_1(%arg0: i32) -> (i32, i32) {
    %c0_i32 = arith.constant 0 : i32
    %c0_i32_0 = arith.constant 0 : i32
    %c0_i32_1 = arith.constant 0 : i32
    return %c0_i32, %c0_i32_0 : i32, i32
  }
  func.func @transform_2(%arg0: i32) -> (i32, i32) {
    %c0_i32 = arith.constant 0 : i32
    %c0_i32_0 = arith.constant 0 : i32
    %c0_i32_1 = arith.constant 0 : i32
    return %c0_i32, %c0_i32_0 : i32, i32
  }
  func.func @transform_3(%arg0: i32) -> (i32, i32) {
    %c0_i32 = arith.constant 0 : i32
    %c0_i32_0 = arith.constant 0 : i32
    %c0_i32_1 = arith.constant 0 : i32
    return %c0_i32, %c0_i32_0 : i32, i32
  }
  func.func @transform_4(%arg0: i32) -> (i32, i32) {
    %c0_i32 = arith.constant 0 : i32
    %c0_i32_0 = arith.constant 0 : i32
    %c0_i32_1 = arith.constant 0 : i32
    return %c0_i32, %c0_i32_0 : i32, i32
  }
  func.func @transform_5(%arg0: i32) -> (i32, i32) {
    %c0_i32 = arith.constant 0 : i32
    %c0_i32_0 = arith.constant 0 : i32
    %c0_i32_1 = arith.constant 0 : i32
    return %c0_i32, %c0_i32_0 : i32, i32
  }
  func.func @transform_6(%arg0: i32) -> (i32, i32) {
    %c0_i32 = arith.constant 0 : i32
    %c0_i32_0 = arith.constant 0 : i32
    %c0_i32_1 = arith.constant 0 : i32
    return %c0_i32, %c0_i32_0 : i32, i32
  }
  func.func @transform_7(%arg0: i32) -> (i32, i32) {
    %c0_i32 = arith.constant 0 : i32
    %c0_i32_0 = arith.constant 0 : i32
    return %arg0, %c0_i32 : i32, i32
  }
}

</mosaic_0001>

<bundles_post_ra>
// kernel: tpu_custom_call.1
= control target key start
LH: loop header
LB: loop body
LE: loop exit
PB: predicated region body
PF: predicated region fallthrough
CT: control target
= control target key end

     0   :  { %12 = vsyncpa [#allocation3], 0  ;;  %s453_s0 = inlined_call_operand.hbm [shape: bf16[8,16], index: 0, kind: input, shape index: {}]   ;;  %s454_s1 = inlined_call_operand.hbm [shape: bf16[16,32], index: 1, kind: input, shape index: {}]   ;;  %s455_s2 = inlined_call_operand.vmem [shape: f32[1,32], index: 2, kind: input, shape index: {}]   ;;  %s456_s3 = inlined_call_operand.hbm [shape: bf16[32,32], index: 3, kind: input, shape index: {}]   ;;  %s457_s4 = inlined_call_operand.vmem [shape: f32[1,32], index: 4, kind: input, shape index: {}]   ;;  %s458_s5 = inlined_call_operand.hbm [shape: bf16[32,128], index: 5, kind: input, shape index: {}]   ;;  %s459_s6 = inlined_call_operand.vmem [shape: f32[1,128], index: 6, kind: input, shape index: {}]   ;;  %s460_s7 = inlined_call_operand.hbm [shape: f32[8,128], index: 7, kind: output, shape index: {}]  }
   0x1   :  { %13 = vsyncpa [#allocation6], 0 }
   0x2   :  { %14 = vsyncpa [#allocation9], 0  ;;  %s31_s26 = sshll.u32 %s454_s1, 4  ;;  %s32_s26 = int_to_ptr.hbm [resolvable:$true] %s31_s26 }
   0x3   :  { %15 = vsyncpa [#allocation4], 0  ;;  %s382_s27 = smov [#allocation5]   ;;  %s21_s8 = sshll.u32 %s453_s0, 4  ;;  %s22_s8 = int_to_ptr.hbm [resolvable:$true] %s21_s8 }
   0x4   :  { %s33_s28 = sshll.u32 %s382_s27, 4  ;;  %s383_s9 = smov 64   ;;  %s34_s28 = int_to_ptr.vmem [resolvable:$true] %s33_s28 }
   0x5   :  { %s384_s10 = smov 4   ;;  %s385_s11 = smov [#allocation2]  }
   0x6   :  { %39 = dma.hbm_to_vmem [thread:$0]  %s32_s26, 128, %s34_s28, [#allocation6], %s383_s9, %s383_s9, %s384_s10  }
   0x7   :  { %s23_s12 = sshll.u32 %s385_s11, 4  ;;  %s46_s15 = sshll.u32 %s456_s3, 4  ;;  %s24_s12 = int_to_ptr.vmem [resolvable:$true] %s23_s12  ;;  %s47_s15 = int_to_ptr.hbm [resolvable:$true] %s46_s15 }
   0x8   :  { %26 = dma.hbm_to_vmem [thread:$0]  %s22_s8, 64, %s24_s12, [#allocation3]  }
   0x9   :  { %s61_s17 = sshll.u32 %s458_s5, 4  ;;  %s386_s18 = smov [#allocation7]   ;;  %s62_s17 = int_to_ptr.hbm [resolvable:$true] %s61_s17 }
   0xa   :  { %s48_s19 = sshll.u32 %s386_s18, 4  ;;  %s387_s0 = smov [#allocation8]   ;;  %s49_s19 = int_to_ptr.vmem [resolvable:$true] %s48_s19 }
   0xb   :  { %54 = dma.hbm_to_vmem [thread:$0]  %s47_s15, 256, %s49_s19, [#allocation6], %s383_s9, %s383_s9, %s384_s10  }
   0xc   :  { %s63_s20 = sshll.u32 %s387_s0, 4  ;;  %s64_s20 = int_to_ptr.vmem [resolvable:$true] %s63_s20 }
   0xd   :  { %69 = dma.hbm_to_vmem [thread:$0]  %s62_s17, 256, %s64_s20, [#allocation9], %s383_s9, %s383_s9, %s384_s10  }
   0xe   :  { %374 = dma.done.wait [#allocation3], 64  }
   0xf   :  { %375 = vsyncadd [#allocation3], 4294967232 }
  0x10   :  { %376 = dma.done.wait [#allocation6], 384  }
  0x11   :  { %377 = vsyncadd [#allocation6], 4294966912 }
  0x12   :  { %378 = dma.done.wait [#allocation9], 256  }
  0x13   :  { %379 = vsyncadd [#allocation9], 4294967040  ;;  %v239_v0 = vld [vmem:[#allocation5] sm:$0xff]  ;;  %v89_v1 = vld [vmem:[#allocation2] sm:$0xf]  ;;  %vm102_vm0 = vcmask 130048  }
  0x14   :  { %113 = vmatpush.bf16.msra.mxu0 %v239_v0  ;;  %v241_v2 = vld [vmem:[#allocation7 + $0x8] sm:$0xff]  ;;  %v240_v3 = vld [vmem:[#allocation7] sm:$0xff]  ;;  %v251_v4 = vld [vmem:[%s455_s2] ss:$0 sm:$0xff]  ;;  %vm141_vm1 = vcmask 261120   ;;  %s388_s24 = smov [#allocation10]  }
  0x15   :  { %151 = vmatpush.bf16.msra.mxu1 %v241_v2  ;;  %v243_v10 = vld [vmem:[#allocation8 + $0x8] sm:$0xff]  ;;  %v242_v11 = vld [vmem:[#allocation8] sm:$0xff]  ;;  %s202_s25 = sshll.u32 %s388_s24, 4  ;;  %s204_s28 = sshll.u32 %s460_s7, 4  ;;  %s203_s25 = int_to_ptr.vmem [resolvable:$true] %s202_s25  ;;  %s205_s28 = int_to_ptr.hbm [resolvable:$true] %s204_s28 }
  0x16   :  { %189 = vmatpush.bf16.msra.mxu2 %v243_v10  ;;  %v252_v12 = vld [vmem:[%s457_s4] ss:$0 sm:$0xff] }
  0x17   :  { %220 = vmatmul.msk.bf16.vlgmr.msra.gmra.mxu0 %vm102_vm0, %v89_v1  ;;  %v253_v18 = vld [vmem:[%s459_s6] ss:$0 sm:$0xff] }
  0x19   :  { %152 = vmatpush.bf16.msra.mxu1 %v240_v3 }
  0x1a   :  { %190 = vmatpush.bf16.msra.mxu2 %v242_v11 }
  0x94   :  { %v115_v5 = vpop.f32.mrf.mxu0 }
  0x95   :  { %v116_v6 = vadd.f32 %v251_v4, %v115_v5 }
  0x97   :  { %v119_v7 = vmax.f32 %v116_v6, 0.0 }
  0x99   :  { %v120_v8 = vpack.c.bf16 %v119_v7, %v119_v7 }
  0x9b   :  { %229 = vmatmul.msk.bf16.vlgmr.msra.gmra.mxu1 %vm141_vm1, %v120_v8 }
  0x9c   :  { %v117_v9 = vpop.f32.mrf.mxu0 }
 0x118   :  { %v154_v13 = vpop.f32.mrf.mxu1 }
 0x119   :  { %v155_v14 = vadd.f32 %v252_v12, %v154_v13 }
 0x11b   :  { %v158_v15 = vmax.f32 %v155_v14, 0.0 }
 0x11d   :  { %v159_v16 = vpack.c.bf16 %v158_v15, %v158_v15 }
 0x11f   :  { %238 = vmatmul.msk.bf16.vlgmr.msra.gmra.mxu2 %vm141_vm1, %v159_v16 }
 0x120   :  { %v156_v17 = vpop.f32.mrf.mxu1 }
 0x1a2   :  { %v192_v19 = vpop.f32.mrf.mxu2 }
 0x1a3   :  { %v193_v20 = vadd.f32 %v253_v18, %v192_v19 }
 0x1a5   :  { %196 = vst [vmem:[#allocation10] sm:$0xff] %v193_v20 }
 0x1a6   :  { %207 = dma.vmem_to_hbm [thread:$0]  %s203_s25, 128, %s205_s28, [#allocation4]  }
 0x1aa   :  { %v194_v21 = vpop.f32.mrf.mxu2 }
 0x1ab   :  { %380 = dma.done.wait [#allocation4], 128  }
 0x1ac   :  { %381 = vsyncadd [#allocation4], 4294967168 }
 0x1ad   :  { %212 = vsyncpa [#allocation3], 1 }
 0x1ae   :  { %213 = vsyncpa [#allocation6], 1 }
 0x1af   :  { %214 = vsyncpa [#allocation9], 1 }
 0x1b0   :  { %215 = vsyncpa [#allocation4], 1 }

</bundles_post_ra>
